<compile_context>
chip_gen: v7x
topology: tpu7x:2x2x1
jax: 0.10.0
libtpu: 0.0.40
codegen_flags: <defaults>
</compile_context>

<pallas_src>
import functools

import jax
import jax.numpy as jnp
from jax.experimental import pallas as pl
from jax.experimental.pallas import tpu as pltpu


def _unet_fused_kernel(x_ref, m_ref, w1_ref, b1_ref, w2_ref, b2_ref,
                       w3_ref, b3_ref, w4_ref, b4_ref, o_ref, pad_ref,
                       *, k2, k3, k4):
    """One grid step = TB batch elements, all four conv+SiLU layers fused.

    Rows of every activation are the flat batch-major sequence r = t*L1 + j
    (t = batch-in-block, j = position).  Rows whose window would cross a batch
    boundary are computed but discarded (wrapper gathers the valid rows).

    x_ref  : (R1, K1*Cin)  bf16   layer-1 im2col patches (stride-2 pre-gathered)
    m_ref  : (R3, 1)       f32    1.0 on valid layer-3 rows, 0.0 on cross-batch rows
    w*_ref : (K*Cin, Cout) bf16   lane-dense flattened weights
    b*_ref : (1, Cout)     f32
    o_ref  : (R4, 512)     f32    flat channels-last output
    pad_ref: (R3+2, 128)   f32    scratch; rows 0 and R3+1 are the conv4 zero pad
    """
    f32 = jnp.float32
    bf16 = jnp.bfloat16

    def silu(v):
        return v * jax.nn.sigmoid(v)

    r1 = x_ref.shape[0]
    r2 = r1 - (k2 - 1)
    r3 = r2 - (k3 - 1)
    r4 = o_ref.shape[0]

    # ---- layer 1: strided conv as a single im2col matmul (M = R1 rows) ----
    h1 = silu(jnp.dot(x_ref[...], w1_ref[...], preferred_element_type=f32)
              + b1_ref[...])                                          # (R1, 8) f32

    # ---- layer 2: lane-axis im2col -> one (R2, K2*8) @ (K2*8, 32) matmul ----
    p2 = jnp.concatenate([h1[k:k + r2, :] for k in range(k2)], axis=-1)
    h2 = silu(jnp.dot(p2.astype(bf16), w2_ref[...], preferred_element_type=f32)
              + b2_ref[...])                                          # (R2, 32) f32

    # ---- layer 3: one (R3, K3*32) @ (K3*32, 128) matmul ----
    p3 = jnp.concatenate([h2[k:k + r3, :] for k in range(k3)], axis=-1)
    h3 = silu(jnp.dot(p3.astype(bf16), w3_ref[...], preferred_element_type=f32)
              + b3_ref[...])                                          # (R3, 128) f32

    # conv4 padding=1: only the two pad rows are zeroed; the {0,1} mask kills
    # cross-batch rows so every batch element sees exact zero padding.
    zrow = jnp.zeros((1, pad_ref.shape[1]), pad_ref.dtype)
    pad_ref[pl.ds(0, 1), :] = zrow
    pad_ref[pl.ds(r3 + 1, 1), :] = zrow
    pad_ref[pl.ds(1, r3), :] = h3 * m_ref[...]

    # ---- layer 4: one (R4, K4*128) @ (K4*128, 512) matmul ----
    p4 = jnp.concatenate([pad_ref[pl.ds(k, r4), :] for k in range(k4)], axis=-1)
    o_ref[...] = silu(jnp.dot(p4.astype(bf16), w4_ref[...],
                              preferred_element_type=f32)
                      + b4_ref[...]).astype(o_ref.dtype)


def _choose_num_blocks(batch):
    """2 balanced 'parallel' steps on v7x (2 TCs), otherwise as few steps as possible."""
    try:
        kind = jax.devices()[0].device_kind.lower()
    except Exception:  # pragma: no cover - defensive
        kind = ""
    min_blocks = 2 if ("v7" in kind and batch >= 2 and batch % 2 == 0) else 1
    blocks = max(min_blocks, pl.cdiv(batch, 64))   # cap ~64 batch elems per step
    while batch % blocks != 0:
        blocks += 1
    return blocks


def unet_encoder_forward(x, params, num_blocks=None):
    """x: (B, num_features, seq_len) NCW.  Returns (B, 512, L4) NCW (PyTorch layout)."""
    B, cin, lin = x.shape
    co1, _, k1 = params["w1"].shape
    co2, _, k2 = params["w2"].shape
    co3, _, k3 = params["w3"].shape
    co4, _, k4 = params["w4"].shape
    s1, p4 = 2, 1                       # conv1 stride=2, conv4 padding=1 (module spec)

    l1 = (lin - k1) // s1 + 1
    l2 = l1 - k2 + 1
    l3 = l2 - k3 + 1
    l4 = l3 + 2 * p4 - k4 + 1

    if num_blocks is None:
        num_blocks = _choose_num_blocks(B)
    g = num_blocks
    tb = B // g                          # batch elements folded into one grid step
    r1 = tb * l1                         # flat rows per grid step
    r2 = r1 - (k2 - 1)
    r3 = r2 - (k3 - 1)
    r4 = r3 + 2 * p4 - k4 + 1            # == r3 for k4=3, p4=1

    # Wrapper-side im2col for the strided first layer, batch-major flat rows per
    # block: (g, TB*L1, K1*Cin), column index = k*Cin + c.
    x_lc = jnp.transpose(x, (0, 2, 1)).astype(jnp.float32)             # (B, Lin, Cin)
    cols = [x_lc[:, k:k + s1 * (l1 - 1) + 1:s1, :] for k in range(k1)]
    x_im = jnp.concatenate(cols, axis=-1)                              # (B, L1, K1*Cin)
    x_im = x_im.reshape(g, r1, k1 * cin).astype(jnp.bfloat16)

    # Lane-dense flattened weights: (Cout, Cin, K) -> (K*Cin, Cout), bf16 for the MXU.
    def flat_w(w):
        co, ci, k = w.shape
        return jnp.transpose(w, (2, 1, 0)).reshape(k * ci, co).astype(jnp.bfloat16)

    w1f = flat_w(params["w1"])
    w2f = flat_w(params["w2"])
    w3f = flat_w(params["w3"])
    w4f = flat_w(params["w4"])
    b1 = params["b1"].reshape(1, co1).astype(jnp.float32)
    b2 = params["b2"].reshape(1, co2).astype(jnp.float32)
    b3 = params["b3"].reshape(1, co3).astype(jnp.float32)
    b4 = params["b4"].reshape(1, co4).astype(jnp.float32)

    # Valid-row mask for layer-3 rows (1.0 where the row belongs to a real batch
    # position < L3; 0.0 on rows that straddle a batch boundary -> conv4 zero pad).
    rows = jnp.arange(r3)
    mask = ((rows % l1) < l3).astype(jnp.float32).reshape(r3, 1)

    c2 = lambda i: (0, 0)               # constant index map for weights / biases / mask
    kernel = functools.partial(_unet_fused_kernel, k2=k2, k3=k3, k4=k4)

    out_flat = pl.pallas_call(
        kernel,
        out_shape=jax.ShapeDtypeStruct((g, r4, co4), jnp.float32),
        grid_spec=pltpu.PrefetchScalarGridSpec(
            num_scalar_prefetch=0,
            grid=(g,),
            in_specs=[
                pl.BlockSpec((pl.Squeezed(), r1, k1 * cin), lambda i: (i, 0, 0)),
                pl.BlockSpec(mask.shape, c2),
                pl.BlockSpec(w1f.shape, c2),
                pl.BlockSpec(b1.shape, c2),
                pl.BlockSpec(w2f.shape, c2),
                pl.BlockSpec(b2.shape, c2),
                pl.BlockSpec(w3f.shape, c2),
                pl.BlockSpec(b3.shape, c2),
                pl.BlockSpec(w4f.shape, c2),
                pl.BlockSpec(b4.shape, c2),
            ],
            out_specs=pl.BlockSpec((pl.Squeezed(), r4, co4), lambda i: (i, 0, 0)),
            scratch_shapes=[pltpu.VMEM((r3 + 2, co3), jnp.float32)],  # conv4 pad buffer
        ),
        compiler_params=pltpu.CompilerParams(dimension_semantics=("parallel",)),
    )(x_im, mask, w1f, b1, w2f, b2, w3f, b3, w4f, b4)

    # Gather the valid rows (drop the cross-batch garbage rows) and return NCW.
    idx = (jnp.arange(tb)[:, None] * l1 + jnp.arange(l4)[None, :]).reshape(-1)
    out = out_flat[:, idx, :].reshape(B, l4, co4)                      # (B, L4, 512)
    return jnp.transpose(out, (0, 2, 1))                               # (B, 512, L4)


def init_params(key, num_features):
    """Deterministic synthetic parameters matching the PyTorch module shapes."""
    shapes = [
        (8, num_features, 5),   # conv1: k=5, stride=2
        (32, 8, 3),             # conv2: k=3
        (128, 32, 5),           # conv3: k=5
        (512, 128, 3),          # conv4: k=3, padding=1
    ]
    params = {}
    for idx, shp in enumerate(shapes, start=1):
        key, kw, kb = jax.random.split(key, 3)
        fan_in = shp[1] * shp[2]
        bound = 1.0 / jnp.sqrt(fan_in)
        params[f"w{idx}"] = jax.random.uniform(
            kw, shp, jnp.float32, minval=-bound, maxval=bound
        )
        params[f"b{idx}"] = jax.random.uniform(
            kb, (shp[0],), jnp.float32, minval=-bound, maxval=bound
        )
    return params


def _conv1d_silu_ref(x, w, b, stride, padding):
    out = jax.lax.conv_general_dilated(
        x, w, window_strides=(stride,), padding=[(padding, padding)],
        dimension_numbers=("NCH", "OIH", "NCH"),
    )
    out = out + b[None, :, None]
    return out * jax.nn.sigmoid(out)


def unet_encoder_ref(x, params):
    # Dropout1d(p=0) is identity, so it is omitted.
    # TODO(synk): add stochastic channel dropout (pltpu.prng_*) if dropout > 0 is needed.
    out = _conv1d_silu_ref(x, params["w1"], params["b1"], 2, 0)
    out = _conv1d_silu_ref(out, params["w2"], params["b2"], 1, 0)
    out = _conv1d_silu_ref(out, params["w3"], params["b3"], 1, 0)
    out = _conv1d_silu_ref(out, params["w4"], params["b4"], 1, 1)
    return out


if __name__ == "__main__":
    key = jax.random.PRNGKey(0)
    k_x, k_p = jax.random.split(key)

    batch, num_features, seq_len = 2, 4, 28   # module default seq_len=28
    x = jax.random.normal(k_x, (batch, num_features, seq_len), jnp.float32)
    params = init_params(k_p, num_features)

    fwd = jax.jit(unet_encoder_forward)
    out = jax.block_until_ready(fwd(x, params))

    # Sanity: shape matches PyTorch semantics; values match an f32 XLA reference
    # (tolerance loosened because MXU operands are bf16 with f32 accumulation).
    assert out.shape == (batch, 512, 6), out.shape
    ref = jax.block_until_ready(unet_encoder_ref(x, params))
    max_err = float(jnp.max(jnp.abs(out - ref)))
    assert jnp.allclose(out, ref, atol=5e-2, rtol=5e-2), max_err

    print("KERNEL_OK")
</pallas_src>

<mosaic_0001>
module attributes {stable_mosaic.version = 11 : i64} {
  func.func @_unet_fused_kernel(%arg0: i32, %arg1: memref<1x24x20xbf16, #tpu.memory_space<vmem>>, %arg2: memref<18x1xf32, #tpu.memory_space<vmem>>, %arg3: memref<20x8xbf16, #tpu.memory_space<vmem>>, %arg4: memref<1x8xf32, #tpu.memory_space<vmem>>, %arg5: memref<24x32xbf16, #tpu.memory_space<vmem>>, %arg6: memref<1x32xf32, #tpu.memory_space<vmem>>, %arg7: memref<160x128xbf16, #tpu.memory_space<vmem>>, %arg8: memref<1x128xf32, #tpu.memory_space<vmem>>, %arg9: memref<384x512xbf16, #tpu.memory_space<vmem>>, %arg10: memref<1x512xf32, #tpu.memory_space<vmem>>, %arg11: memref<1x18x512xf32, #tpu.memory_space<vmem>>, %arg12: memref<20x128xf32, #tpu.memory_space<vmem>>) attributes {dimension_semantics = [#tpu.dimension_semantics<parallel>], iteration_bounds = array<i64: 1>, scalar_prefetch = 0 : i64, scratch_operands = 1 : i64, tpu.core_type = #tpu.core_type<tc>, window_params = [{transform_indices = @transform_0, window_bounds = array<i64: 1, 24, 20>}, {pipeline_mode = #tpu.pipeline_mode<synchronous>, transform_indices = @transform_1, window_bounds = array<i64: 18, 1>}, {pipeline_mode = #tpu.pipeline_mode<synchronous>, transform_indices = @transform_2, window_bounds = array<i64: 20, 8>}, {pipeline_mode = #tpu.pipeline_mode<synchronous>, transform_indices = @transform_3, window_bounds = array<i64: 1, 8>}, {pipeline_mode = #tpu.pipeline_mode<synchronous>, transform_indices = @transform_4, window_bounds = array<i64: 24, 32>}, {pipeline_mode = #tpu.pipeline_mode<synchronous>, transform_indices = @transform_5, window_bounds = array<i64: 1, 32>}, {pipeline_mode = #tpu.pipeline_mode<synchronous>, transform_indices = @transform_6, window_bounds = array<i64: 160, 128>}, {pipeline_mode = #tpu.pipeline_mode<synchronous>, transform_indices = @transform_7, window_bounds = array<i64: 1, 128>}, {pipeline_mode = #tpu.pipeline_mode<synchronous>, transform_indices = @transform_8, window_bounds = array<i64: 384, 512>}, {pipeline_mode = #tpu.pipeline_mode<synchronous>, transform_indices = @transform_9, window_bounds = array<i64: 1, 512>}, {transform_indices = @transform_10, window_bounds = array<i64: 1, 18, 512>}]} {
    %c0 = arith.constant 0 : index
    %c0_0 = arith.constant 0 : index
    %c0_1 = arith.constant 0 : index
    %0 = vector.load %arg1[%c0, %c0_0, %c0_1] : memref<1x24x20xbf16, #tpu.memory_space<vmem>>, vector<1x24x20xbf16>
    %1 = vector.shape_cast %0 : vector<1x24x20xbf16> to vector<24x20xbf16>
    %c0_2 = arith.constant 0 : index
    %c0_3 = arith.constant 0 : index
    %2 = vector.load %arg3[%c0_2, %c0_3] : memref<20x8xbf16, #tpu.memory_space<vmem>>, vector<20x8xbf16>
    %cst = arith.constant dense<0.000000e+00> : vector<24x8xf32>
    %3 = tpu.matmul %1, %2, %cst {dimension_numbers = #tpu.dot_dimension_numbers<[1], [0], [0], [1], [0, 0, 1, 1], [], []>} : vector<24x20xbf16>, vector<20x8xbf16>, vector<24x8xf32> -> vector<24x8xf32>
    %c0_4 = arith.constant 0 : index
    %c0_5 = arith.constant 0 : index
    %4 = vector.load %arg4[%c0_4, %c0_5] : memref<1x8xf32, #tpu.memory_space<vmem>>, vector<1x8xf32>
    %5 = vector.broadcast %4 : vector<1x8xf32> to vector<24x8xf32>
    %6 = arith.addf %3, %5 : vector<24x8xf32>
    %7 = arith.negf %6 : vector<24x8xf32>
    %8 = math.exp %7 : vector<24x8xf32>
    %cst_6 = arith.constant 1.000000e+00 : f32
    %9 = vector.broadcast %cst_6 : f32 to vector<24x8xf32>
    %10 = arith.addf %9, %8 : vector<24x8xf32>
    %11 = arith.divf %9, %10 : vector<24x8xf32>
    %12 = arith.mulf %6, %11 : vector<24x8xf32>
    %13 = vector.extract_strided_slice %12 {offsets = [0, 0], sizes = [22, 8], strides = [1, 1]} : vector<24x8xf32> to vector<22x8xf32>
    %14 = vector.extract_strided_slice %12 {offsets = [1, 0], sizes = [22, 8], strides = [1, 1]} : vector<24x8xf32> to vector<22x8xf32>
    %15 = vector.extract_strided_slice %12 {offsets = [2, 0], sizes = [22, 8], strides = [1, 1]} : vector<24x8xf32> to vector<22x8xf32>
    %16 = tpu.concatenate %13, %14, %15 in 1 : vector<22x8xf32>, vector<22x8xf32>, vector<22x8xf32> -> vector<22x24xf32>
    %17 = arith.truncf %16 : vector<22x24xf32> to vector<22x24xbf16>
    %c0_7 = arith.constant 0 : index
    %c0_8 = arith.constant 0 : index
    %18 = vector.load %arg5[%c0_7, %c0_8] : memref<24x32xbf16, #tpu.memory_space<vmem>>, vector<24x32xbf16>
    %cst_9 = arith.constant dense<0.000000e+00> : vector<22x32xf32>
    %19 = tpu.matmul %17, %18, %cst_9 {dimension_numbers = #tpu.dot_dimension_numbers<[1], [0], [0], [1], [0, 0, 1, 1], [], []>} : vector<22x24xbf16>, vector<24x32xbf16>, vector<22x32xf32> -> vector<22x32xf32>
    %c0_10 = arith.constant 0 : index
    %c0_11 = arith.constant 0 : index
    %20 = vector.load %arg6[%c0_10, %c0_11] : memref<1x32xf32, #tpu.memory_space<vmem>>, vector<1x32xf32>
    %21 = vector.broadcast %20 : vector<1x32xf32> to vector<22x32xf32>
    %22 = arith.addf %19, %21 : vector<22x32xf32>
    %23 = arith.negf %22 : vector<22x32xf32>
    %24 = math.exp %23 : vector<22x32xf32>
    %cst_12 = arith.constant 1.000000e+00 : f32
    %25 = vector.broadcast %cst_12 : f32 to vector<22x32xf32>
    %26 = arith.addf %25, %24 : vector<22x32xf32>
    %27 = arith.divf %25, %26 : vector<22x32xf32>
    %28 = arith.mulf %22, %27 : vector<22x32xf32>
    %29 = vector.extract_strided_slice %28 {offsets = [0, 0], sizes = [18, 32], strides = [1, 1]} : vector<22x32xf32> to vector<18x32xf32>
    %30 = vector.extract_strided_slice %28 {offsets = [1, 0], sizes = [18, 32], strides = [1, 1]} : vector<22x32xf32> to vector<18x32xf32>
    %31 = vector.extract_strided_slice %28 {offsets = [2, 0], sizes = [18, 32], strides = [1, 1]} : vector<22x32xf32> to vector<18x32xf32>
    %32 = vector.extract_strided_slice %28 {offsets = [3, 0], sizes = [18, 32], strides = [1, 1]} : vector<22x32xf32> to vector<18x32xf32>
    %33 = vector.extract_strided_slice %28 {offsets = [4, 0], sizes = [18, 32], strides = [1, 1]} : vector<22x32xf32> to vector<18x32xf32>
    %34 = tpu.concatenate %29, %30, %31, %32, %33 in 1 : vector<18x32xf32>, vector<18x32xf32>, vector<18x32xf32>, vector<18x32xf32>, vector<18x32xf32> -> vector<18x160xf32>
    %35 = arith.truncf %34 : vector<18x160xf32> to vector<18x160xbf16>
    %c0_13 = arith.constant 0 : index
    %c0_14 = arith.constant 0 : index
    %36 = vector.load %arg7[%c0_13, %c0_14] : memref<160x128xbf16, #tpu.memory_space<vmem>>, vector<160x128xbf16>
    %cst_15 = arith.constant dense<0.000000e+00> : vector<18x128xf32>
    %37 = tpu.matmul %35, %36, %cst_15 {dimension_numbers = #tpu.dot_dimension_numbers<[1], [0], [0], [1], [0, 0, 1, 1], [], []>} : vector<18x160xbf16>, vector<160x128xbf16>, vector<18x128xf32> -> vector<18x128xf32>
    %c0_16 = arith.constant 0 : index
    %c0_17 = arith.constant 0 : index
    %38 = vector.load %arg8[%c0_16, %c0_17] : memref<1x128xf32, #tpu.memory_space<vmem>>, vector<1x128xf32>
    %39 = vector.broadcast %38 : vector<1x128xf32> to vector<18x128xf32>
    %40 = arith.addf %37, %39 : vector<18x128xf32>
    %41 = arith.negf %40 : vector<18x128xf32>
    %42 = math.exp %41 : vector<18x128xf32>
    %cst_18 = arith.constant 1.000000e+00 : f32
    %43 = vector.broadcast %cst_18 : f32 to vector<18x128xf32>
    %44 = arith.addf %43, %42 : vector<18x128xf32>
    %45 = arith.divf %43, %44 : vector<18x128xf32>
    %46 = arith.mulf %40, %45 : vector<18x128xf32>
    %cst_19 = arith.constant 0.000000e+00 : f32
    %47 = vector.broadcast %cst_19 : f32 to vector<1x128xf32>
    %c0_20 = arith.constant 0 : index
    %c0_21 = arith.constant 0 : index
    %48 = vector.load %arg12[%c0_20, %c0_21] : memref<20x128xf32, #tpu.memory_space<vmem>>, vector<1x128xf32>
    tpu.vector_store %arg12[%c0_20, %c0_21], %47 {strides = array<i32>} : memref<20x128xf32, #tpu.memory_space<vmem>>, vector<1x128xf32>,
    %c19 = arith.constant 19 : index
    %c0_22 = arith.constant 0 : index
    %49 = vector.load %arg12[%c19, %c0_22] : memref<20x128xf32, #tpu.memory_space<vmem>>, vector<1x128xf32>
    tpu.vector_store %arg12[%c19, %c0_22], %47 {strides = array<i32>} : memref<20x128xf32, #tpu.memory_space<vmem>>, vector<1x128xf32>,
    %c0_23 = arith.constant 0 : index
    %c0_24 = arith.constant 0 : index
    %50 = vector.load %arg2[%c0_23, %c0_24] : memref<18x1xf32, #tpu.memory_space<vmem>>, vector<18x1xf32>
    %51 = vector.broadcast %50 : vector<18x1xf32> to vector<18x128xf32>
    %52 = arith.mulf %46, %51 : vector<18x128xf32>
    %c1 = arith.constant 1 : index
    %c0_25 = arith.constant 0 : index
    %53 = vector.load %arg12[%c1, %c0_25] : memref<20x128xf32, #tpu.memory_space<vmem>>, vector<18x128xf32>
    tpu.vector_store %arg12[%c1, %c0_25], %52 {strides = array<i32>} : memref<20x128xf32, #tpu.memory_space<vmem>>, vector<18x128xf32>,
    %c0_26 = arith.constant 0 : index
    %c0_27 = arith.constant 0 : index
    %54 = vector.load %arg12[%c0_26, %c0_27] : memref<20x128xf32, #tpu.memory_space<vmem>>, vector<18x128xf32>
    %c1_28 = arith.constant 1 : index
    %c0_29 = arith.constant 0 : index
    %55 = vector.load %arg12[%c1_28, %c0_29] : memref<20x128xf32, #tpu.memory_space<vmem>>, vector<18x128xf32>
    %c2 = arith.constant 2 : index
    %c0_30 = arith.constant 0 : index
    %56 = vector.load %arg12[%c2, %c0_30] : memref<20x128xf32, #tpu.memory_space<vmem>>, vector<18x128xf32>
    %57 = tpu.concatenate %54, %55, %56 in 1 : vector<18x128xf32>, vector<18x128xf32>, vector<18x128xf32> -> vector<18x384xf32>
    %58 = arith.truncf %57 : vector<18x384xf32> to vector<18x384xbf16>
    %c0_31 = arith.constant 0 : index
    %c0_32 = arith.constant 0 : index
    %59 = vector.load %arg9[%c0_31, %c0_32] : memref<384x512xbf16, #tpu.memory_space<vmem>>, vector<384x512xbf16>
    %cst_33 = arith.constant dense<0.000000e+00> : vector<18x512xf32>
    %60 = tpu.matmul %58, %59, %cst_33 {dimension_numbers = #tpu.dot_dimension_numbers<[1], [0], [0], [1], [0, 0, 1, 1], [], []>} : vector<18x384xbf16>, vector<384x512xbf16>, vector<18x512xf32> -> vector<18x512xf32>
    %c0_34 = arith.constant 0 : index
    %c0_35 = arith.constant 0 : index
    %61 = vector.load %arg10[%c0_34, %c0_35] : memref<1x512xf32, #tpu.memory_space<vmem>>, vector<1x512xf32>
    %62 = vector.broadcast %61 : vector<1x512xf32> to vector<18x512xf32>
    %63 = arith.addf %60, %62 : vector<18x512xf32>
    %64 = arith.negf %63 : vector<18x512xf32>
    %65 = math.exp %64 : vector<18x512xf32>
    %cst_36 = arith.constant 1.000000e+00 : f32
    %66 = vector.broadcast %cst_36 : f32 to vector<18x512xf32>
    %67 = arith.addf %66, %65 : vector<18x512xf32>
    %68 = arith.divf %66, %67 : vector<18x512xf32>
    %69 = arith.mulf %63, %68 : vector<18x512xf32>
    %c0_37 = arith.constant 0 : index
    %c0_38 = arith.constant 0 : index
    %c0_39 = arith.constant 0 : index
    %70 = vector.load %arg11[%c0_37, %c0_38, %c0_39] : memref<1x18x512xf32, #tpu.memory_space<vmem>>, vector<1x18x512xf32>
    %71 = vector.shape_cast %70 : vector<1x18x512xf32> to vector<18x512xf32>
    %72 = vector.shape_cast %69 : vector<18x512xf32> to vector<1x18x512xf32>
    tpu.vector_store %arg11[%c0_37, %c0_38, %c0_39], %72 {strides = array<i32>} : memref<1x18x512xf32, #tpu.memory_space<vmem>>, vector<1x18x512xf32>,
    return
  }
  func.func @transform_0(%arg0: i32) -> (i32, i32, i32) {
    %c0_i32 = arith.constant 0 : i32
    %c0_i32_0 = arith.constant 0 : i32
    %c0_i32_1 = arith.constant 0 : i32
    return %arg0, %c0_i32, %c0_i32_0 : i32, i32, i32
  }
  func.func @transform_1(%arg0: i32) -> (i32, i32) {
    %c0_i32 = arith.constant 0 : i32
    %c0_i32_0 = arith.constant 0 : i32
    %c0_i32_1 = arith.constant 0 : i32
    return %c0_i32, %c0_i32_0 : i32, i32
  }
  func.func @transform_2(%arg0: i32) -> (i32, i32) {
    %c0_i32 = arith.constant 0 : i32
    %c0_i32_0 = arith.constant 0 : i32
    %c0_i32_1 = arith.constant 0 : i32
    return %c0_i32, %c0_i32_0 : i32, i32
  }
  func.func @transform_3(%arg0: i32) -> (i32, i32) {
    %c0_i32 = arith.constant 0 : i32
    %c0_i32_0 = arith.constant 0 : i32
    %c0_i32_1 = arith.constant 0 : i32
    return %c0_i32, %c0_i32_0 : i32, i32
  }
  func.func @transform_4(%arg0: i32) -> (i32, i32) {
    %c0_i32 = arith.constant 0 : i32
    %c0_i32_0 = arith.constant 0 : i32
    %c0_i32_1 = arith.constant 0 : i32
    return %c0_i32, %c0_i32_0 : i32, i32
  }
  func.func @transform_5(%arg0: i32) -> (i32, i32) {
    %c0_i32 = arith.constant 0 : i32
    %c0_i32_0 = arith.constant 0 : i32
    %c0_i32_1 = arith.constant 0 : i32
    return %c0_i32, %c0_i32_0 : i32, i32
  }
  func.func @transform_6(%arg0: i32) -> (i32, i32) {
    %c0_i32 = arith.constant 0 : i32
    %c0_i32_0 = arith.constant 0 : i32
    %c0_i32_1 = arith.constant 0 : i32
    return %c0_i32, %c0_i32_0 : i32, i32
  }
  func.func @transform_7(%arg0: i32) -> (i32, i32) {
    %c0_i32 = arith.constant 0 : i32
    %c0_i32_0 = arith.constant 0 : i32
    %c0_i32_1 = arith.constant 0 : i32
    return %c0_i32, %c0_i32_0 : i32, i32
  }
  func.func @transform_8(%arg0: i32) -> (i32, i32) {
    %c0_i32 = arith.constant 0 : i32
    %c0_i32_0 = arith.constant 0 : i32
    %c0_i32_1 = arith.constant 0 : i32
    return %c0_i32, %c0_i32_0 : i32, i32
  }
  func.func @transform_9(%arg0: i32) -> (i32, i32) {
    %c0_i32 = arith.constant 0 : i32
    %c0_i32_0 = arith.constant 0 : i32
    %c0_i32_1 = arith.constant 0 : i32
    return %c0_i32, %c0_i32_0 : i32, i32
  }
  func.func @transform_10(%arg0: i32) -> (i32, i32, i32) {
    %c0_i32 = arith.constant 0 : i32
    %c0_i32_0 = arith.constant 0 : i32
    %c0_i32_1 = arith.constant 0 : i32
    return %arg0, %c0_i32, %c0_i32_0 : i32, i32, i32
  }
}

</mosaic_0001>

<bundles_post_ra>
// kernel: unet_encoder_forward.1
= control target key start
LH: loop header
LB: loop body
LE: loop exit
PB: predicated region body
PF: predicated region fallthrough
CT: control target
= control target key end

     0   :  { %vm66_vm0 = vcmask 162816   ;;  %vm73_vm1 = vcmask 1041408   ;;  %vm215_vm2 = vcmask 1043456   ;;  %vm164_vm3 = vcmask 1045504   ;;  %s1938_s24 = smov 8   ;;  %s2507_s2 = inlined_call_operand.vmem [shape: bf16[20,8], index: 2, kind: input, shape index: {}]   ;;  %s2508_s0 = inlined_call_operand.vmem [shape: bf16[1,24,20], index: 0, kind: input, shape index: {}]   ;;  %s2509_s4 = inlined_call_operand.vmem [shape: bf16[24,32], index: 4, kind: input, shape index: {}]   ;;  %s2510_s3 = inlined_call_operand.vmem [shape: f32[1,8], index: 3, kind: input, shape index: {}]   ;;  %s2511_s6 = inlined_call_operand.vmem [shape: bf16[160,128], index: 6, kind: input, shape index: {}]   ;;  %s2512_s5 = inlined_call_operand.vmem [shape: f32[1,32], index: 5, kind: input, shape index: {}]   ;;  %s2513_s8 = inlined_call_operand.vmem [shape: bf16[384,512], index: 8, kind: input, shape index: {}]   ;;  %s2514_s1 = inlined_call_operand.vmem [shape: f32[18,1], index: 1, kind: input, shape index: {}]   ;;  %s2515_s7 = inlined_call_operand.vmem [shape: f32[1,128], index: 7, kind: input, shape index: {}]   ;;  %s2516_s9 = inlined_call_operand.vmem [shape: f32[1,512], index: 9, kind: input, shape index: {}]   ;;  %s2517_s10 = inlined_call_operand.vmem [shape: f32[1,18,512], index: 10, kind: output, shape index: {}]  }
   0x1   :  { %v1693_v0 = vld [vmem:[%s2507_s2] sm:$0xff]   ;;  %v1694_v1 = vld [vmem:[%s2507_s2 + $0x8] ss:$0 sps:$4 sm:$0x33]   ;;  %vm149_vm4 = vcmask 1046528   ;;  %vm179_vm5 = vcmask 64512  }
   0x2   :  { %v1695_v2 = vld [vmem:[%s2508_s0] sm:$0xff]   ;;  %1613 = vmatprep.subr.bf16.mxu1 %v1693_v0  ;;  %v75_v3 = vsel %vm73_vm1, %v1694_v1, 0  ;;  %v1696_v4 = vld [vmem:[%s2508_s0 + $0x8] ss:$0 sps:$4 sm:$0xff]   ;;  %vm183_vm6 = vcmask 130048   ;;  %vm208_vm7 = vcmask 195584  }
   0x3   :  { %1614 = vmatpush3.bf16.msra.mxu1 %v1693_v0  ;;  %1617 = vmatprep.mubr.msk.bf16.mxu1 %vm66_vm0, %v1695_v2  ;;  %v1697_v5 = vld [vmem:[%s2509_s4] sm:$0xff]   ;;  %v1698_v23 = vld [vmem:[%s2509_s4 + $0x8] ss:$0 sps:$4 sm:$0xff]   ;;  %s1937_s4 = smov 16   ;;  %v1939_v59 = vmov 0   ;;  %v1701_v62 = vld [vmem:[%s2511_s6 + $0x10] sm:$0xff]  }
   0x4   :  { %1657 = vmatprep.subr.msk.bf16.mxu1 %vm73_vm1, %v1694_v1  ;;  %v1463_v6 = vld [vmem:[%s2510_s3] ss:$0 sm:$0xff]  ;;  %v217_v28 = vsel %vm215_vm2, %v1698_v23, 0  ;;  %451 = vmatprep.subr.bf16.mxu0 %v1939_v59  ;;  %v1700_v61 = vld [vmem:[%s2511_s6 + $0x8] sm:$0xff]   ;;  %v1702_v63 = vld [vmem:[%s2511_s6 + $0x18] sm:$0xff]   ;;  %vm342_vm8 = vcmask 261120  }
   0x5   :  { %v1699_v60 = vld [vmem:[%s2511_s6] sm:$0xff]   ;;  %1692 = vset.pattern.permute.xlu1 %v1939_v59  ;;  %1691 = vset.pattern.permute.xlu0 %v1939_v59  ;;  %v1704_v1 = vld [vmem:[%s2511_s6 + $0x28] sm:$0xff]   ;;  %v1705_v2 = vld [vmem:[%s2511_s6 + $0x30] sm:$0xff]   ;;  %vm319_vm9 = vcmask 1044480   ;;  %s1941_s3 = smov 32   ;;  %vm346_vm10 = vcmask 523264  }
   0x6   :  { %452 = vmatpush1.bf16.msra.mxu0 %v1699_v60  ;;  %v1703_v0 = vld [vmem:[%s2511_s6 + $0x20] sm:$0xff]   ;;  %vm350_vm11 = vcmask 785408  }
   0x7   :  { %1616 = vmatpush3.bf16.msra.mxu1 %v75_v3  ;;  %453 = vmatprep.subr.bf16.mxu0 %v1939_v59  ;;  %v1706_v3 = vld [vmem:[%s2511_s6 + $0x38] sm:$0xff]   ;;  %v1715_v60 = vld [vmem:[%s2513_s8 + $0x20] ss:$16 sps:$4 sm:$0xff]  }
   0x8   :  { %1621 = vmatprep.subr.bf16.mxu1 %v1697_v5 }
   0xa   :  { %1618 = vmatmul.mubr.msk.bf16.vlgmr.msra.gmra.mrb[0].mxu1 %vm66_vm0, %v1696_v4  ;;  %454 = vmatpush1.bf16.msra.mxu0 %v1700_v61  ;;  %v1473_v4 = vld [vmem:[%s2512_s5] ss:$0 sm:$0xff]  ;;  %v524_v61 = vld [vmem:[%s2514_s1 + $0x10] sm:$0x3] }
   0xb   :  { %1622 = vmatpush3.bf16.msra.mxu1 %v1697_v5  ;;  %455 = vmatprep.subr.bf16.mxu0 %v1939_v59 }
   0xc   :  { %1658 = vmatprep.subr.msk.bf16.mxu1 %vm215_vm2, %v1698_v23 }
   0xe   :  { %456 = vmatpush1.bf16.msra.mxu0 %v1701_v62  ;;  %v1723_v62 = vld [vmem:[%s2513_s8 + $0x44] ss:$16 sps:$4 sm:$0xff]  }
   0xf   :  { %1624 = vmatpush3.bf16.msra.mxu1 %v217_v28  ;;  %457 = vmatprep.subr.bf16.mxu0 %v1939_v59 }
  0x12   :  { %458 = vmatpush1.bf16.msra.mxu0 %v1702_v63  ;;  %v1721_v63 = vld [vmem:[%s2513_s8 + $0x40] ss:$16 sps:$4 sm:$0xff]  }
  0x13   :  { %459 = vmatprep.subr.bf16.mxu0 %v1939_v59 }
  0x16   :  { %460 = vmatpush1.bf16.msra.mxu0 %v1703_v0  ;;  %v1729_v0 = vld [vmem:[%s2513_s8 + $0x64] ss:$16 sps:$4 sm:$0xff]  }
  0x17   :  { %461 = vmatprep.subr.bf16.mxu0 %v1939_v59 }
  0x1a   :  { %462 = vmatpush1.bf16.msra.mxu0 %v1704_v1  ;;  %v1727_v1 = vld [vmem:[%s2513_s8 + $0x60] ss:$16 sps:$4 sm:$0xff]  }
  0x1b   :  { %463 = vmatprep.subr.bf16.mxu0 %v1939_v59 }
  0x1e   :  { %464 = vmatpush1.bf16.msra.mxu0 %v1705_v2  ;;  %v1735_v2 = vld [vmem:[%s2513_s8 + $0x84] ss:$16 sps:$4 sm:$0xff]  }
  0x1f   :  { %465 = vmatprep.subr.bf16.mxu0 %v1939_v59 }
  0x22   :  { %466 = vmatpush1.bf16.msra.mxu0 %v1706_v3  ;;  %v1733_v3 = vld [vmem:[%s2513_s8 + $0x80] ss:$16 sps:$4 sm:$0xff]  }
  0x23   :  { %467 = vmatprep.subr.bf16.mxu0 %v1939_v59 }
  0xdd   :  { %v1619_v7 = vpop.f32.mrb[0].mxu1 }
  0xde   :  { %v120_v8 = vadd.f32 %v1619_v7, %v1463_v6  ;;  %v111_v9 = vpop.f32.mrb[1].mxu1 }
  0xdf   :  { %v112_v10 = vadd.f32 %v1463_v6, %v111_v9  ;;  %v1620_v11 = vpop.f32.mrb[2].mxu1 }
  0xe0   :  { %v1472_v12 = vmul.f32 -1.442695, %v120_v8  ;;  %v114_v13 = vpop.f32.mrb[3].mxu1 }
  0xe1   :  { %v1470_v14 = vmul.f32 -1.442695, %v112_v10  ;;  %v115_v15 = vadd.f32 %v1463_v6, %v114_v13 }
  0xe2   :  { %1853 = vpow2.f32 %v1472_v12 }
  0xe3   :  { %1855 = vpow2.f32 %v1470_v14  ;;  %v1471_v16 = vmul.f32 -1.442695, %v115_v15 }
  0xe5   :  { %1857 = vpow2.f32 %v1471_v16 }
  0xec   :  { %v1854_v17 = vpop.eup %1853 }
  0xed   :  { %v1856_v18 = vpop.eup %1855  ;;  %v136_v19 = vadd.f32 1.0, %v1854_v17 }
  0xee   :  { %v134_v20 = vadd.f32 1.0, %v1856_v18 }
  0xef   :  { %v1858_v21 = vpop.eup %1857  ;;  %1859 = vrcp.f32 %v136_v19 }
  0xf0   :  { %1861 = vrcp.f32 %v134_v20  ;;  %v135_v22 = vadd.f32 1.0, %v1858_v21 }
  0xf2   :  { %1863 = vrcp.f32 %v135_v22  ;;  %v1707_v22 = vld [vmem:[%s2511_s6 + $0x40] sm:$0xff]  }
  0xf3   :  { %468 = vmatpush1.bf16.msra.mxu0 %v1707_v22 }
  0xf4   :  { %469 = vmatprep.subr.bf16.mxu0 %v1939_v59 }
  0xf9   :  { %v1860_v24 = vpop.eup %1859 }
  0xfa   :  { %v1862_v25 = vpop.eup %1861  ;;  %v145_v26 = vmul.f32 %v1860_v24, %v120_v8 }
  0xfb   :  { %v143_v27 = vmul.f32 %v1862_v25, %v112_v10 }
  0xfc   :  { %v1864_v29 = vpop.eup %1863  ;;  %v168_v31 = vrot.slane %v145_v26, 2  ;;  %v153_v32 = vrot.slane %v145_v26, 1 }
  0xfd   :  { %v144_v30 = vmul.f32 %v1864_v29, %v115_v15  ;;  %v165_v33 = vrot.slane %v143_v27, 2  ;;  %v150_v35 = vrot.slane %v143_v27, 1 }
  0xff   :  { %v166_v34 = vrot.slane %v144_v30, 2  ;;  %v151_v36 = vrot.slane %v144_v30, 1 }
 0x101   :  { %v167_v37 = vsel %vm164_vm3, %v165_v33, %v166_v34  ;;  %v169_v38 = vsel %vm164_vm3, %v166_v34, %v168_v31  ;;  %v152_v39 = vsel %vm149_vm4, %v150_v35, %v151_v36  ;;  %v154_v40 = vsel %vm149_vm4, %v151_v36, %v153_v32 }
 0x102   :  { %v1671_v41 = vpack.i.bf16 %v169_v38, %v167_v37  ;;  %v1666_v42 = vpack.i.bf16 %v154_v40, %v152_v39 }
 0x104   :  { %1672 = vrot.lane.b32.xlu1 %v1671_v41, %s1937_s4  ;;  %1667 = vrot.lane.b32.xlu0 %v1666_v42, %s1938_s24 }
 0x108   :  { %174 = vrot.lane.b32.xlu1 %v168_v31, %s1937_s4  ;;  %159 = vrot.lane.b32.xlu0 %v153_v32, %s1938_s24  ;;  %s1942_s4 = smov 96  }
 0x176   :  { %v1673_v43 = vpop.permute.xlu1 %1672  ;;  %v1668_v44 = vpop.permute.xlu0 %1667 }
 0x177   :  { %v1675_v45 = vunpack.i.h.bf16 %v1673_v43  ;;  %v1674_v46 = vunpack.i.l.bf16 %v1673_v43  ;;  %v1670_v47 = vunpack.i.h.bf16 %v1668_v44  ;;  %v1669_v48 = vunpack.i.l.bf16 %v1668_v44 }
 0x179   :  { %v180_v49 = vsel %vm179_vm5, %v143_v27, %v1669_v48  ;;  %v181_v50 = vsel %vm179_vm5, %v144_v30, %v1670_v47  ;;  %v1708_v27 = vld [vmem:[%s2511_s6 + $0x48] sm:$0xff]   ;;  %s1940_s6 = smov 64  }
 0x17a   :  { %v175_v51 = vpop.permute.xlu1 %174  ;;  %v160_v52 = vpop.permute.xlu0 %159  ;;  %v184_v53 = vsel %vm183_vm6, %v180_v49, %v1674_v46  ;;  %v185_v54 = vsel %vm183_vm6, %v181_v50, %v1675_v45  ;;  %470 = vmatpush1.bf16.msra.mxu0 %v1708_v27 }
 0x17b   :  { %v182_v55 = vsel %vm179_vm5, %v145_v26, %v160_v52  ;;  %v187_v56 = vpack.c.bf16 %v185_v54, %v184_v53  ;;  %v1709_v53 = vld [vmem:[%s2513_s8] ss:$16 sps:$4 sm:$0xff]   ;;  %v1711_v54 = vld [vmem:[%s2513_s8 + $0x4] ss:$16 sps:$4 sm:$0xff]  }
 0x17c   :  { %v186_v57 = vsel %vm183_vm6, %v182_v55, %v175_v51  ;;  %v523_v55 = vld [vmem:[%s2514_s1 + $0x8] sm:$0xff]  ;;  %1159 = vmatprep.subr.bf16.mxu1 %v1711_v54 }
 0x17d   :  { %v188_v58 = vpack.c.bf16 %v186_v57, %v186_v57  ;;  %1625 = vmatprep.mubr.msk.bf16.mxu1 %vm208_vm7, %v187_v56  ;;  %v1714_v56 = vld [vmem:[%s2513_s8 + $0xc] ss:$16 sps:$4 sm:$0xff]   ;;  %v522_v57 = vld [vmem:[%s2514_s1] sm:$0xff] }
 0x17e   :  { %1261 = vmatprep.subr.bf16.mxu0 %v1714_v56  ;;  %v1768_v54 = vld [vmem:[%s2513_s8 + $0x12c] ss:$16 sps:$4 sm:$0xff]   ;;  %v1766_v56 = vld [vmem:[%s2513_s8 + $0x128] ss:$16 sps:$4 sm:$0xff]  }
 0x17f   :  { %1626 = vmatmul.mubr.msk.bf16.vlgmr.msra.gmra.mrb[4].mxu1 %vm208_vm7, %v188_v58  ;;  %v1717_v58 = vld [vmem:[%s2513_s8 + $0x24] ss:$16 sps:$4 sm:$0xff]  }
 0x180   :  { %1160 = vmatpush1.bf16.msra.mxu1 %v1709_v53  ;;  %v1765_v53 = vld [vmem:[%s2513_s8 + $0x124] ss:$16 sps:$4 sm:$0xff]  }
 0x181   :  { %1161 = vmatprep.subr.bf16.mxu1 %v1717_v58  ;;  %v1774_v58 = vld [vmem:[%s2513_s8 + $0x14c] ss:$16 sps:$4 sm:$0xff]  }
 0x184   :  { %1162 = vmatpush1.bf16.msra.mxu1 %v1715_v60  ;;  %v1769_v60 = vld [vmem:[%s2513_s8 + $0x140] ss:$16 sps:$4 sm:$0xff]  }
 0x185   :  { %1163 = vmatprep.subr.bf16.mxu1 %v1723_v62  ;;  %v1777_v62 = vld [vmem:[%s2513_s8 + $0x164] ss:$16 sps:$4 sm:$0xff]  }
 0x188   :  { %1164 = vmatpush1.bf16.msra.mxu1 %v1721_v63  ;;  %v1780_v63 = vld [vmem:[%s2513_s8 + $0x16c] ss:$16 sps:$4 sm:$0xff]  }
 0x189   :  { %1165 = vmatprep.subr.bf16.mxu1 %v1729_v0  ;;  %v1775_v0 = vld [vmem:[%s2513_s8 + $0x160] ss:$16 sps:$4 sm:$0xff]  }
 0x18c   :  { %1166 = vmatpush1.bf16.msra.mxu1 %v1727_v1  ;;  %v1778_v1 = vld [vmem:[%s2513_s8 + $0x168] ss:$16 sps:$4 sm:$0xff]  }
 0x18d   :  { %1167 = vmatprep.subr.bf16.mxu1 %v1735_v2  ;;  %v1783_v2 = vld [vmem:[%s2513_s8 + $0x184] ss:$16 sps:$4 sm:$0xff]  }
 0x190   :  { %1168 = vmatpush1.bf16.msra.mxu1 %v1733_v3  ;;  %v1786_v3 = vld [vmem:[%s2513_s8 + $0x18c] ss:$16 sps:$4 sm:$0xff]  }
 0x252   :  { %v1627_v5 = vpop.f32.mrb[4].mxu1 }
 0x253   :  { %v262_v6 = vadd.f32 %v1627_v5, %v1473_v4  ;;  %v253_v7 = vpop.f32.mrb[5].mxu1 }
 0x254   :  { %v254_v8 = vadd.f32 %v1473_v4, %v253_v7  ;;  %v1628_v9 = vpop.f32.mrb[6].mxu1 }
 0x255   :  { %v1480_v10 = vmul.f32 -1.442695, %v262_v6  ;;  %v256_v11 = vpop.f32.mrb[7].mxu1 }
 0x256   :  { %v1478_v12 = vmul.f32 -1.442695, %v254_v8  ;;  %v257_v13 = vadd.f32 %v1473_v4, %v256_v11 }
 0x257   :  { %1865 = vpow2.f32 %v1480_v10 }
 0x258   :  { %1867 = vpow2.f32 %v1478_v12  ;;  %v1479_v14 = vmul.f32 -1.442695, %v257_v13 }
 0x25a   :  { %1869 = vpow2.f32 %v1479_v14 }
 0x261   :  { %v1866_v15 = vpop.eup %1865 }
 0x262   :  { %v1868_v16 = vpop.eup %1867  ;;  %v278_v17 = vadd.f32 1.0, %v1866_v15 }
 0x263   :  { %v276_v18 = vadd.f32 1.0, %v1868_v16 }
 0x264   :  { %v1870_v19 = vpop.eup %1869  ;;  %1871 = vrcp.f32 %v278_v17 }
 0x265   :  { %1873 = vrcp.f32 %v276_v18  ;;  %v277_v20 = vadd.f32 1.0, %v1870_v19 }
 0x267   :  { %1875 = vrcp.f32 %v277_v20  ;;  %v1712_v20 = vld [vmem:[%s2513_s8 + $0x8] ss:$16 sps:$4 sm:$0xff]  }
 0x26e   :  { %v1872_v21 = vpop.eup %1871 }
 0x26f   :  { %v1874_v23 = vpop.eup %1873  ;;  %v2067_v24 = vmul.f32 %v1872_v21, %v262_v6 }
 0x270   :  { %v2069_v25 = vmul.f32 %v1874_v23, %v254_v8  ;;  %v1720_v23 = vld [vmem:[%s2513_s8 + $0x2c] ss:$16 sps:$4 sm:$0xff]  }
 0x271   :  { %v1876_v26 = vpop.eup %1875  ;;  %v2079_v30 = vrot.slane %v2067_v24, 4  ;;  %v308_v31 = vrot.slane %v2067_v24, 2  ;;  %v294_v32 = vrot.slane %v2067_v24, 1  ;;  %v323_v40 = vrot.slane %v2067_v24, 3 }
 0x272   :  { %v2075_v28 = vmul.f32 %v1876_v26, %v257_v13  ;;  %v334_v29 = vrot.slane %v2069_v25, 4  ;;  %v305_v34 = vrot.slane %v2069_v25, 2  ;;  %v291_v37 = vrot.slane %v2069_v25, 1 }
 0x273   :  { %v320_v38 = vrot.slane %v2069_v25, 3  ;;  %v357_v26 = vpack.c.bf16 %v2079_v30, %v2079_v30 }
 0x274   :  { %v335_v33 = vrot.slane %v2075_v28, 4  ;;  %v306_v35 = vrot.slane %v2075_v28, 2  ;;  %v292_v36 = vrot.slane %v2075_v28, 1  ;;  %v321_v39 = vrot.slane %v2075_v28, 3 }
 0x276   :  { %v336_v41 = vsel %vm215_vm2, %v334_v29, %v335_v33  ;;  %v338_v42 = vsel %vm215_vm2, %v335_v33, %v2079_v30  ;;  %v307_v43 = vsel %vm164_vm3, %v305_v34, %v306_v35  ;;  %v309_v44 = vsel %vm164_vm3, %v306_v35, %v308_v31  ;;  %v1718_v29 = vld [vmem:[%s2513_s8 + $0x28] ss:$16 sps:$4 sm:$0xff]   ;;  %v1732_v33 = vld [vmem:[%s2513_s8 + $0x6c] ss:$16 sps:$4 sm:$0xff]  }
 0x277   :  { %v355_v45 = vpack.c.bf16 %v338_v42, %v336_v41  ;;  %v1681_v46 = vpack.i.bf16 %v309_v44, %v307_v43  ;;  %v293_v47 = vsel %vm149_vm4, %v291_v37, %v292_v36  ;;  %v295_v48 = vsel %vm149_vm4, %v292_v36, %v294_v32  ;;  %v1724_v30 = vld [vmem:[%s2513_s8 + $0x48] ss:$16 sps:$4 sm:$0xff]   ;;  %v1738_v35 = vld [vmem:[%s2513_s8 + $0x8c] ss:$16 sps:$4 sm:$0xff]   ;;  %v1741_v37 = vld [vmem:[%s2513_s8 + $0xa4] ss:$16 sps:$4 sm:$0xff]  }
 0x278   :  { %v1676_v49 = vpack.i.bf16 %v295_v48, %v293_v47  ;;  %v322_v50 = vsel %vm319_vm9, %v320_v38, %v321_v39  ;;  %v324_v51 = vsel %vm319_vm9, %v321_v39, %v323_v40  ;;  %v1730_v34 = vld [vmem:[%s2513_s8 + $0x68] ss:$16 sps:$4 sm:$0xff]   ;;  %v1744_v38 = vld [vmem:[%s2513_s8 + $0xac] ss:$16 sps:$4 sm:$0xff]   ;;  %v1739_v39 = vld [vmem:[%s2513_s8 + $0xa0] ss:$16 sps:$4 sm:$0xff]   ;;  %1169 = vmatprep.subr.bf16.mxu1 %v1741_v37 }
 0x279   :  { %1492 = vmatprep.mubr.msk.bf16.mxu0 %vm342_vm8, %v355_v45  ;;  %1682 = vrot.lane.b32.xlu1 %v1681_v46, %s1940_s6  ;;  %v1686_v52 = vpack.i.bf16 %v324_v51, %v322_v50  ;;  %v1736_v36 = vld [vmem:[%s2513_s8 + $0x88] ss:$16 sps:$4 sm:$0xff]   ;;  %v1747_v41 = vld [vmem:[%s2513_s8 + $0xc4] ss:$16 sps:$4 sm:$0xff]   ;;  %v1750_v42 = vld [vmem:[%s2513_s8 + $0xcc] ss:$16 sps:$4 sm:$0xff]  }
 0x27a   :  { %1677 = vrot.lane.b32.xlu0 %v1676_v49, %s1941_s3  ;;  %1170 = vmatpush1.bf16.msra.mxu1 %v1739_v39  ;;  %v1745_v43 = vld [vmem:[%s2513_s8 + $0xc0] ss:$16 sps:$4 sm:$0xff]   ;;  %v1748_v44 = vld [vmem:[%s2513_s8 + $0xc8] ss:$16 sps:$4 sm:$0xff]   ;;  %v1753_v45 = vld [vmem:[%s2513_s8 + $0xe4] ss:$16 sps:$4 sm:$0xff]  }
 0x27b   :  { %1171 = vmatprep.subr.bf16.mxu1 %v1747_v41  ;;  %v1756_v46 = vld [vmem:[%s2513_s8 + $0xec] ss:$16 sps:$4 sm:$0xff]   ;;  %v1751_v47 = vld [vmem:[%s2513_s8 + $0xe0] ss:$16 sps:$4 sm:$0xff]   ;;  %v1754_v48 = vld [vmem:[%s2513_s8 + $0xe8] ss:$16 sps:$4 sm:$0xff]  }
 0x27c   :  { %v1759_v49 = vld [vmem:[%s2513_s8 + $0x104] ss:$16 sps:$4 sm:$0xff]   ;;  %v1762_v50 = vld [vmem:[%s2513_s8 + $0x10c] ss:$16 sps:$4 sm:$0xff]   ;;  %v1757_v51 = vld [vmem:[%s2513_s8 + $0x100] ss:$16 sps:$4 sm:$0xff]  }
 0x27d   :  { %300 = vrot.lane.b32.xlu1 %v294_v32, %s1941_s3 }
 0x27e   :  { %1687 = vrot.lane.b32.xlu0 %v1686_v52, %s1942_s4  ;;  %1172 = vmatpush1.bf16.msra.mxu1 %v1745_v43  ;;  %v1760_v52 = vld [vmem:[%s2513_s8 + $0x108] ss:$16 sps:$4 sm:$0xff]  }
 0x27f   :  { %1173 = vmatprep.subr.bf16.mxu1 %v1753_v45 }
 0x281   :  { %329 = vrot.lane.b32.xlu1 %v323_v40, %s1942_s4  ;;  %v1742_v40 = vld [vmem:[%s2513_s8 + $0xa8] ss:$16 sps:$4 sm:$0xff]  }
 0x282   :  { %314 = vrot.lane.b32.xlu0 %v308_v31, %s1940_s6  ;;  %v1726_v31 = vld [vmem:[%s2513_s8 + $0x4c] ss:$16 sps:$4 sm:$0xff]   ;;  %1174 = vmatpush1.bf16.msra.mxu1 %v1751_v47 }
 0x283   :  { %1175 = vmatprep.subr.bf16.mxu1 %v1759_v49 }
 0x285   :  { %532 = vperm.xlu1 %1692, %v523_v55   ;;  %v1763_v55 = vld [vmem:[%s2513_s8 + $0x120] ss:$16 sps:$4 sm:$0xff]  }
 0x286   :  { %527 = vperm.xlu0 %1691, %v522_v57   ;;  %1176 = vmatpush1.bf16.msra.mxu1 %v1757_v51  ;;  %v1771_v57 = vld [vmem:[%s2513_s8 + $0x144] ss:$16 sps:$4 sm:$0xff]  }
 0x287   :  { %1177 = vmatprep.subr.bf16.mxu1 %v1765_v53 }
 0x289   :  { %537 = vperm.xlu1 %1692, %v524_v61   ;;  %v1772_v61 = vld [vmem:[%s2513_s8 + $0x148] ss:$16 sps:$4 sm:$0xff]  }
 0x28a   :  { %1178 = vmatpush1.bf16.msra.mxu1 %v1763_v55  ;;  %v1805_v55 = vld [vmem:[%s2513_s8 + $0x200] ss:$16 sps:$4 sm:$0xff]  }
 0x28b   :  { %1179 = vmatprep.subr.bf16.mxu1 %v1771_v57 }
 0x28e   :  { %1180 = vmatpush1.bf16.msra.mxu1 %v1769_v60 }
 0x28f   :  { %1181 = vmatprep.subr.bf16.mxu1 %v1777_v62  ;;  %v1816_v62 = vld [vmem:[%s2513_s8 + $0x22c] ss:$16 sps:$4 sm:$0xff]  }
 0x292   :  { %1182 = vmatpush1.bf16.msra.mxu1 %v1775_v0  ;;  %v1814_v0 = vld [vmem:[%s2513_s8 + $0x228] ss:$16 sps:$4 sm:$0xff]  }
 0x293   :  { %1183 = vmatprep.subr.bf16.mxu1 %v1783_v2 }
 0x2eb   :  { %v1683_v4 = vpop.permute.xlu1 %1682 }
 0x2ec   :  { %v1678_v5 = vpop.permute.xlu0 %1677  ;;  %v1685_v8 = vunpack.i.h.bf16 %v1683_v4  ;;  %v1684_v9 = vunpack.i.l.bf16 %v1683_v4  ;;  %v1781_v4 = vld [vmem:[%s2513_s8 + $0x180] ss:$16 sps:$4 sm:$0xff]  }
 0x2ed   :  { %v1680_v6 = vunpack.i.h.bf16 %v1678_v5  ;;  %v1679_v7 = vunpack.i.l.bf16 %v1678_v5  ;;  %v1784_v5 = vld [vmem:[%s2513_s8 + $0x188] ss:$16 sps:$4 sm:$0xff]   ;;  %1184 = vmatpush1.bf16.msra.mxu1 %v1781_v4 }
 0x2ef   :  { %v344_v10 = vsel %vm342_vm8, %v2075_v28, %v1680_v6  ;;  %v343_v11 = vsel %vm342_vm8, %v2069_v25, %v1679_v7  ;;  %v301_v12 = vpop.permute.xlu1 %300  ;;  %v1789_v6 = vld [vmem:[%s2513_s8 + $0x1a4] ss:$16 sps:$4 sm:$0xff]   ;;  %v1792_v7 = vld [vmem:[%s2513_s8 + $0x1ac] ss:$16 sps:$4 sm:$0xff]  }
 0x2f0   :  { %v1688_v13 = vpop.permute.xlu0 %1687  ;;  %v347_v16 = vsel %vm346_vm10, %v343_v11, %v1684_v9  ;;  %v348_v17 = vsel %vm346_vm10, %v344_v10, %v1685_v8  ;;  %v345_v25 = vsel %vm342_vm8, %v2067_v24, %v301_v12  ;;  %v1787_v8 = vld [vmem:[%s2513_s8 + $0x1a0] ss:$16 sps:$4 sm:$0xff]   ;;  %v1790_v9 = vld [vmem:[%s2513_s8 + $0x1a8] ss:$16 sps:$4 sm:$0xff]   ;;  %1185 = vmatprep.subr.bf16.mxu1 %v1789_v6  ;;  %v1943_v10 = vmov 0.0  }
 0x2f1   :  { %v1690_v14 = vunpack.i.h.bf16 %v1688_v13  ;;  %v1689_v15 = vunpack.i.l.bf16 %v1688_v13  ;;  %1186 = vmatpush1.bf16.msra.mxu1 %v1787_v8  ;;  %520 = vst [vmem:[#allocation2] sm:$0x1] %v1943_v10  ;;  %521 = vst [vmem:[#allocation2 + $0x13] sm:$0x1] %v1943_v10  ;;  %v1795_v11 = vld [vmem:[%s2513_s8 + $0x1c4] ss:$16 sps:$4 sm:$0xff]  }
 0x2f2   :  { %v1798_v12 = vld [vmem:[%s2513_s8 + $0x1cc] ss:$16 sps:$4 sm:$0xff]   ;;  %v1793_v13 = vld [vmem:[%s2513_s8 + $0x1c0] ss:$16 sps:$4 sm:$0xff]   ;;  %1187 = vmatprep.subr.bf16.mxu1 %v1795_v11 }
 0x2f3   :  { %v351_v18 = vsel %vm350_vm11, %v347_v16, %v1689_v15  ;;  %v352_v19 = vsel %vm350_vm11, %v348_v17, %v1690_v14  ;;  %v330_v27 = vpop.permute.xlu1 %329  ;;  %v1796_v14 = vld [vmem:[%s2513_s8 + $0x1c8] ss:$16 sps:$4 sm:$0xff]   ;;  %v1801_v15 = vld [vmem:[%s2513_s8 + $0x1e4] ss:$16 sps:$4 sm:$0xff]   ;;  %v1804_v16 = vld [vmem:[%s2513_s8 + $0x1ec] ss:$16 sps:$4 sm:$0xff]  }
 0x2f4   :  { %v315_v21 = vpop.permute.xlu0 %314  ;;  %v354_v22 = vpack.c.bf16 %v352_v19, %v351_v18  ;;  %v1799_v17 = vld [vmem:[%s2513_s8 + $0x1e0] ss:$16 sps:$4 sm:$0xff]   ;;  %v1802_v18 = vld [vmem:[%s2513_s8 + $0x1e8] ss:$16 sps:$4 sm:$0xff]   ;;  %v1807_v19 = vld [vmem:[%s2513_s8 + $0x204] ss:$16 sps:$4 sm:$0xff]  }
 0x2f5   :  { %v349_v28 = vsel %vm346_vm10, %v345_v25, %v315_v21  ;;  %1188 = vmatpush1.bf16.msra.mxu1 %v1793_v13  ;;  %v1481_v21 = vld [vmem:[%s2515_s7] ss:$0 sm:$0xff]  ;;  %v1828_v10 = vld [vmem:[%s2513_s8 + $0x26c] ss:$16 sps:$4 sm:$0xff]   ;;  %v1831_v13 = vld [vmem:[%s2513_s8 + $0x284] ss:$16 sps:$4 sm:$0xff]  }
 0x2f6   :  { %484 = vmatmul.mubr.bf16.vlgmr.msra.gmra.mrb[0].mxu0 %v354_v22  ;;  %v353_v24 = vsel %vm350_vm11, %v349_v28, %v330_v27  ;;  %1189 = vmatprep.subr.bf16.mxu1 %v1801_v15  ;;  %v1817_v6 = vld [vmem:[%s2513_s8 + $0x240] ss:$16 sps:$4 sm:$0xff]  }
 0x2f7   :  { %1493 = vmatprep.mubr.msk.bf16.mxu0 %vm342_vm8, %v357_v26  ;;  %1262 = vmatpush1.bf16.msra.mxu0 %v1712_v20  ;;  %v356_v32 = vpack.c.bf16 %v353_v24, %v353_v24  ;;  %v1810_v20 = vld [vmem:[%s2513_s8 + $0x20c] ss:$16 sps:$4 sm:$0xff]   ;;  %v1823_v11 = vld [vmem:[%s2513_s8 + $0x260] ss:$16 sps:$4 sm:$0xff]  }
 0x2f8   :  { %1263 = vmatprep.subr.bf16.mxu0 %v1720_v23  ;;  %v1829_v15 = vld [vmem:[%s2513_s8 + $0x280] ss:$16 sps:$4 sm:$0xff]  }
 0x2f9   :  { %1190 = vmatpush1.bf16.msra.mxu1 %v1799_v17  ;;  %v1837_v17 = vld [vmem:[%s2513_s8 + $0x2a4] ss:$16 sps:$4 sm:$0xff]  }
 0x2fa   :  { %1210 = vmatprep.subr.bf16.mxu1 %v1807_v19  ;;  %v1835_v19 = vld [vmem:[%s2513_s8 + $0x2a0] ss:$16 sps:$4 sm:$0xff]  }
 0x2fb   :  { %1264 = vmatpush1.bf16.msra.mxu0 %v1718_v29 }
 0x2fc   :  { %1265 = vmatprep.subr.bf16.mxu0 %v1726_v31 }
 0x2fe   :  { %492 = vmatmul.mubr.bf16.gmra.mrb[4].mxu0 %v356_v32 }
 0x2ff   :  { %1266 = vmatpush1.bf16.msra.mxu0 %v1724_v30 }
 0x300   :  { %1267 = vmatprep.subr.bf16.mxu0 %v1732_v33 }
 0x303   :  { %1268 = vmatpush1.bf16.msra.mxu0 %v1730_v34 }
 0x304   :  { %1269 = vmatprep.subr.bf16.mxu0 %v1738_v35 }
 0x305   :  { %v528_v43 = vpop.permute.xlu0 %527 }
 0x307   :  { %1270 = vmatpush1.bf16.msra.mxu0 %v1736_v36 }
 0x308   :  { %1271 = vmatprep.subr.bf16.mxu0 %v1744_v38 }
 0x30b   :  { %1272 = vmatpush1.bf16.msra.mxu0 %v1742_v40 }
 0x30c   :  { %1273 = vmatprep.subr.bf16.mxu0 %v1750_v42 }
 0x30f   :  { %1274 = vmatpush1.bf16.msra.mxu0 %v1748_v44 }
 0x310   :  { %1275 = vmatprep.subr.bf16.mxu0 %v1756_v46 }
 0x313   :  { %1276 = vmatpush1.bf16.msra.mxu0 %v1754_v48  ;;  %v533_v48 = vpop.permute.xlu1 %532 }
 0x314   :  { %1277 = vmatprep.subr.bf16.mxu0 %v1762_v50 }
 0x317   :  { %1278 = vmatpush1.bf16.msra.mxu0 %v1760_v52  ;;  %v538_v53 = vpop.permute.xlu1 %537 }
 0x318   :  { %1279 = vmatprep.subr.bf16.mxu0 %v1768_v54 }
 0x31b   :  { %1280 = vmatpush1.bf16.msra.mxu0 %v1766_v56  ;;  %v1808_v56 = vld [vmem:[%s2513_s8 + $0x208] ss:$16 sps:$4 sm:$0xff]  }
 0x31c   :  { %1281 = vmatprep.subr.bf16.mxu0 %v1774_v58 }
 0x31f   :  { %1282 = vmatpush1.bf16.msra.mxu0 %v1772_v61  ;;  %v1813_v61 = vld [vmem:[%s2513_s8 + $0x224] ss:$16 sps:$4 sm:$0xff]  }
 0x320   :  { %1283 = vmatprep.subr.bf16.mxu0 %v1780_v63  ;;  %v1811_v63 = vld [vmem:[%s2513_s8 + $0x220] ss:$16 sps:$4 sm:$0xff]  }
 0x323   :  { %1284 = vmatpush1.bf16.msra.mxu0 %v1778_v1  ;;  %v1819_v1 = vld [vmem:[%s2513_s8 + $0x244] ss:$16 sps:$4 sm:$0xff]  }
 0x324   :  { %1285 = vmatprep.subr.bf16.mxu0 %v1786_v3  ;;  %v1822_v3 = vld [vmem:[%s2513_s8 + $0x24c] ss:$16 sps:$4 sm:$0xff]  }
 0x327   :  { %1286 = vmatpush1.bf16.msra.mxu0 %v1784_v5 }
 0x328   :  { %1287 = vmatprep.subr.bf16.mxu0 %v1792_v7  ;;  %v1820_v7 = vld [vmem:[%s2513_s8 + $0x248] ss:$16 sps:$4 sm:$0xff]  }
 0x32b   :  { %1288 = vmatpush1.bf16.msra.mxu0 %v1790_v9  ;;  %v1825_v9 = vld [vmem:[%s2513_s8 + $0x264] ss:$16 sps:$4 sm:$0xff]  }
 0x32c   :  { %1289 = vmatprep.subr.bf16.mxu0 %v1798_v12  ;;  %v1826_v12 = vld [vmem:[%s2513_s8 + $0x268] ss:$16 sps:$4 sm:$0xff]  }
 0x32f   :  { %1290 = vmatpush1.bf16.msra.mxu0 %v1796_v14  ;;  %v1834_v14 = vld [vmem:[%s2513_s8 + $0x28c] ss:$16 sps:$4 sm:$0xff]  }
 0x330   :  { %1291 = vmatprep.subr.bf16.mxu0 %v1804_v16  ;;  %v1832_v16 = vld [vmem:[%s2513_s8 + $0x288] ss:$16 sps:$4 sm:$0xff]  }
 0x333   :  { %1292 = vmatpush1.bf16.msra.mxu0 %v1802_v18  ;;  %v1840_v18 = vld [vmem:[%s2513_s8 + $0x2ac] ss:$16 sps:$4 sm:$0xff]  }
 0x334   :  { %1312 = vmatprep.subr.bf16.mxu0 %v1810_v20  ;;  %v1838_v20 = vld [vmem:[%s2513_s8 + $0x2a8] ss:$16 sps:$4 sm:$0xff]  }
 0x3c9   :  { %v485_v22 = vpop.f32.mrb[0].mxu0 }
 0x3ca   :  { %v486_v23 = vadd.f32 %v1481_v21, %v485_v22  ;;  %v487_v25 = vpop.f32.mrb[1].mxu0  ;;  %v1846_v22 = vld [vmem:[%s2513_s8 + $0x2cc] ss:$16 sps:$4 sm:$0xff]  }
 0x3cb   :  { %v488_v26 = vpop.f32.mrb[2].mxu0  ;;  %v1844_v25 = vld [vmem:[%s2513_s8 + $0x2c8] ss:$16 sps:$4 sm:$0xff]  }
 0x3cc   :  { %v1494_v27 = vmul.f32 -1.442695, %v486_v23  ;;  %v489_v28 = vadd.f32 %v1481_v21, %v488_v26  ;;  %v490_v29 = vpop.f32.mrb[3].mxu0  ;;  %v1849_v26 = vld [vmem:[%s2513_s8 + $0x2e4] ss:$16 sps:$4 sm:$0xff]  }
 0x3cd   :  { %v1850_v29 = vld [vmem:[%s2513_s8 + $0x2e8] ss:$16 sps:$4 sm:$0xff]  }
 0x3ce   :  { %1877 = vpow2.f32 %v1494_v27  ;;  %v1495_v31 = vmul.f32 -1.442695, %v489_v28  ;;  %v1852_v27 = vld [vmem:[%s2513_s8 + $0x2ec] ss:$16 sps:$4 sm:$0xff]  }
 0x3d0   :  { %1879 = vpow2.f32 %v1495_v31 }
 0x3d1   :  { %v493_v24 = vpop.f32.mrb[4].mxu0 }
 0x3d2   :  { %v494_v30 = vadd.f32 %v1481_v21, %v493_v24  ;;  %v495_v32 = vpop.f32.mrb[5].mxu0  ;;  %v1843_v21 = vld [vmem:[%s2513_s8 + $0x2c4] ss:$16 sps:$4 sm:$0xff]  }
 0x3d3   :  { %v496_v33 = vpop.f32.mrb[6].mxu0 }
 0x3d4   :  { %v1496_v34 = vmul.f32 -1.442695, %v494_v30  ;;  %v497_v35 = vpop.f32.mrb[7].mxu0 }
 0x3d6   :  { %1881 = vpow2.f32 %v1496_v34  ;;  %v659_v34 = vlaneseq }
 0x3d8   :  { %v1878_v36 = vpop.eup %1877  ;;  %v660_v35 = vshrl.u32 %v659_v34, 7 }
 0x3d9   :  { %v508_v37 = vadd.f32 1.0, %v1878_v36 }
 0x3da   :  { %v1880_v38 = vpop.eup %1879  ;;  %v661_v36 = vsub.s32 0, %v660_v35 }
 0x3db   :  { %1883 = vrcp.f32 %v508_v37  ;;  %v509_v39 = vadd.f32 1.0, %v1880_v38  ;;  %v669_v37 = vsub.s32 2, %v660_v35  ;;  %v657_v38 = vld [vmem:[%s2516_s9] sm:$0xf] }
 0x3dd   :  { %1885 = vrcp.f32 %v509_v39  ;;  %v665_v39 = vsub.s32 1, %v660_v35 }
 0x3e0   :  { %v1882_v40 = vpop.eup %1881 }
 0x3e1   :  { %v510_v41 = vadd.f32 1.0, %v1882_v40  ;;  %v673_v40 = vsub.s32 3, %v660_v35 }
 0x3e3   :  { %1887 = vrcp.f32 %v510_v41  ;;  %v662_v41 = vrot.slane %v657_v38, %v661_v36 }
 0x3e5   :  { %v1884_v42 = vpop.eup %1883 }
 0x3e6   :  { %v517_v44 = vmul.f32 %v1884_v42, %v486_v23  ;;  %v1841_v23 = vld [vmem:[%s2513_s8 + $0x2c0] ss:$16 sps:$4 sm:$0xff]   ;;  %v670_v42 = vrot.slane %v657_v38, %v669_v37 }
 0x3e7   :  { %v1886_v45 = vpop.eup %1885 }
 0x3e8   :  { %v518_v46 = vmul.f32 %v1886_v45, %v489_v28  ;;  %v540_v47 = vmul.f32 %v528_v43, %v517_v44  ;;  %v1847_v28 = vld [vmem:[%s2513_s8 + $0x2e0] ss:$16 sps:$4 sm:$0xff]   ;;  %v666_v43 = vrot.slane %v657_v38, %v665_v39  ;;  %v674_v44 = vrot.slane %v657_v38, %v673_v40 }
 0x3ea   :  { %v541_v49 = vmul.f32 %v533_v48, %v518_v46  ;;  %543 = vst [vmem:[#allocation2 + $0x1] sm:$0xff] %v540_v47 }
 0x3ec   :  { %544 = vst [vmem:[#allocation2 + $0x9] sm:$0xff] %v541_v49  ;;  %v556_v50 = vpack.c.bf16 %v541_v49, %v540_v47 }
 0x3ed   :  { %v1888_v51 = vpop.eup %1887 }
 0x3ee   :  { %v519_v52 = vmul.f32 %v1888_v51, %v494_v30  ;;  %1191 = vmatprep.mubr.bf16.mxu1 %v556_v50  ;;  %1293 = vmatprep.mubr.bf16.mxu0 %v556_v50 }
 0x3f0   :  { %v542_v54 = vmul.f32 %v538_v53, %v519_v52 }
 0x3f1   :  { %v546_v57 = vld [vmem:[#allocation2] sm:$0xff] }
 0x3f2   :  { %545 = vst [vmem:[#allocation2 + $0x11] sm:$0x3] %v542_v54 }
 0x3f3   :  { %v547_v58 = vld [vmem:[#allocation2 + $0x8] sm:$0xff] }
 0x3f4   :  { %v555_v60 = vpack.c.bf16 %v547_v58, %v546_v57  ;;  %v552_v24 = vld [vmem:[#allocation2 + $0x2] sm:$0xff] }
 0x3f6   :  { %1192 = vmatmul.mubr.bf16.vlgmr.msra.gmra.mrb[8].mxu1 %v555_v60  ;;  %1294 = vmatmul.mubr.bf16.vlgmr.msra.gmra.mrb[8].mxu0 %v555_v60 }
 0x3f7   :  { %1211 = vmatpush1.bf16.msra.mxu1 %v1805_v55  ;;  %1313 = vmatpush1.bf16.msra.mxu0 %v1808_v56 }
 0x3f8   :  { %1212 = vmatprep.subr.bf16.mxu1 %v1813_v61  ;;  %1314 = vmatprep.subr.bf16.mxu0 %v1816_v62 }
 0x3f9   :  { %v551_v2 = vld [vmem:[#allocation2 + $0x11] sm:$0x3] }
 0x3fa   :  { %v548_v4 = vld [vmem:[#allocation2 + $0x10] sm:$0x3]  ;;  %v559_v5 = vpack.c.bf16 %v551_v2, %v551_v2  ;;  %v554_v32 = vld [vmem:[#allocation2 + $0x12] sm:$0x3] }
 0x3fb   :  { %1213 = vmatpush1.bf16.msra.mxu1 %v1811_v63  ;;  %1315 = vmatpush1.bf16.msra.mxu0 %v1814_v0  ;;  %v558_v8 = vpack.c.bf16 %v548_v4, %v548_v4  ;;  %v553_v31 = vld [vmem:[#allocation2 + $0xa] sm:$0xff]  ;;  %v560_v33 = vpack.c.bf16 %v554_v32, %v554_v32 }
 0x3fc   :  { %1201 = vmatprep.mubr.bf16.mxu1 %v559_v5  ;;  %1303 = vmatprep.mubr.bf16.mxu0 %v559_v5  ;;  %v557_v30 = vpack.c.bf16 %v553_v31, %v552_v24 }
 0x3fd   :  { %1214 = vmatprep.subr.bf16.mxu1 %v1819_v1  ;;  %1316 = vmatprep.subr.bf16.mxu0 %v1822_v3 }
 0x3fe   :  { %1202 = vmatmul.mubr.bf16.gmra.mrb[12].mxu1 %v558_v8  ;;  %1304 = vmatmul.mubr.bf16.gmra.mrb[12].mxu0 %v558_v8 }
 0x3ff   :  { %1215 = vmatpush1.bf16.msra.mxu1 %v1817_v6  ;;  %1317 = vmatpush1.bf16.msra.mxu0 %v1820_v7 }
 0x400   :  { %1216 = vmatprep.subr.bf16.mxu1 %v1825_v9  ;;  %1318 = vmatprep.subr.bf16.mxu0 %v1828_v10 }
 0x401   :  { %1242 = vmatprep.mubr.bf16.mxu1 %v1939_v59  ;;  %1344 = vmatprep.mubr.bf16.mxu0 %v1939_v59 }
 0x403   :  { %1217 = vmatpush1.bf16.msra.mxu1 %v1823_v11  ;;  %1319 = vmatpush1.bf16.msra.mxu0 %v1826_v12 }
 0x404   :  { %1218 = vmatprep.subr.bf16.mxu1 %v1831_v13  ;;  %1320 = vmatprep.subr.bf16.mxu0 %v1834_v14 }
 0x407   :  { %1219 = vmatpush1.bf16.msra.mxu1 %v1829_v15  ;;  %1321 = vmatpush1.bf16.msra.mxu0 %v1832_v16 }
 0x408   :  { %1220 = vmatprep.subr.bf16.mxu1 %v1837_v17  ;;  %1322 = vmatprep.subr.bf16.mxu0 %v1840_v18 }
 0x40b   :  { %1221 = vmatpush1.bf16.msra.mxu1 %v1835_v19  ;;  %1323 = vmatpush1.bf16.msra.mxu0 %v1838_v20 }
 0x40c   :  { %1222 = vmatprep.subr.bf16.mxu1 %v1843_v21  ;;  %1324 = vmatprep.subr.bf16.mxu0 %v1846_v22 }
 0x40f   :  { %1223 = vmatpush1.bf16.msra.mxu1 %v1841_v23  ;;  %1325 = vmatpush1.bf16.msra.mxu0 %v1844_v25 }
 0x410   :  { %1224 = vmatprep.subr.bf16.mxu1 %v1849_v26  ;;  %1326 = vmatprep.subr.bf16.mxu0 %v1852_v27 }
 0x413   :  { %1225 = vmatpush1.bf16.msra.mxu1 %v1847_v28  ;;  %1327 = vmatpush1.bf16.msra.mxu0 %v1850_v29 }
 0x416   :  { %1243 = vmatmul.mubr.bf16.vlgmr.msra.gmra.mrb[8].mxu1 %v557_v30  ;;  %1345 = vmatmul.mubr.bf16.vlgmr.msra.gmra.mrb[8].mxu0 %v557_v30 }
 0x417   :  { %1252 = vmatprep.mubr.bf16.mxu1 %v1939_v59  ;;  %1354 = vmatprep.mubr.bf16.mxu0 %v1939_v59 }
 0x41e   :  { %1253 = vmatmul.mubr.bf16.gmra.mrb[12].mxu1 %v560_v33  ;;  %1355 = vmatmul.mubr.bf16.gmra.mrb[12].mxu0 %v560_v33 }
 0x4e9   :  { %v1244_v45 = vpop.f32.mrb[8].mxu1  ;;  %v1346_v59 = vpop.f32.mrb[8].mxu0 }
 0x4ea   :  { %v2423_v46 = vadd.f32 %v1244_v45, %v662_v41  ;;  %v2425_v47 = vadd.f32 %v1346_v59, %v670_v42  ;;  %v1246_v48 = vpop.f32.mrb[9].mxu1  ;;  %v1348_v49 = vpop.f32.mrb[9].mxu0 }
 0x4eb   :  { %v2427_v50 = vadd.f32 %v1246_v48, %v666_v43  ;;  %v2429_v51 = vadd.f32 %v1348_v49, %v674_v44  ;;  %v1248_v52 = vpop.f32.mrb[10].mxu1  ;;  %v1350_v53 = vpop.f32.mrb[10].mxu0 }
 0x4ec   :  { %v1593_v54 = vmul.f32 -1.442695, %v2423_v46  ;;  %v1595_v55 = vmul.f32 -1.442695, %v2425_v47  ;;  %v2433_v56 = vadd.f32 %v1248_v52, %v662_v41  ;;  %v2435_v57 = vadd.f32 %v1350_v53, %v670_v42  ;;  %v1250_v58 = vpop.f32.mrb[11].mxu1  ;;  %v1352_v60 = vpop.f32.mrb[11].mxu0 }
 0x4ed   :  { %v1594_v61 = vmul.f32 -1.442695, %v2427_v50  ;;  %v1596_v62 = vmul.f32 -1.442695, %v2429_v51  ;;  %v2439_v63 = vadd.f32 %v1250_v58, %v666_v43  ;;  %v2441_v0 = vadd.f32 %v1352_v60, %v674_v44 }
 0x4ee   :  { %1889 = vpow2.f32 %v1593_v54  ;;  %v1597_v1 = vmul.f32 -1.442695, %v2433_v56  ;;  %v1599_v2 = vmul.f32 -1.442695, %v2435_v57 }
 0x4ef   :  { %1891 = vpow2.f32 %v1595_v55  ;;  %v1598_v3 = vmul.f32 -1.442695, %v2439_v63  ;;  %v1600_v4 = vmul.f32 -1.442695, %v2441_v0 }
 0x4f0   :  { %1893 = vpow2.f32 %v1594_v61 }
 0x4f1   :  { %1895 = vpow2.f32 %v1596_v62  ;;  %v1254_v5 = vpop.f32.mrb[12].mxu1  ;;  %v1356_v6 = vpop.f32.mrb[12].mxu0 }
 0x4f2   :  { %1897 = vpow2.f32 %v1597_v1  ;;  %v2447_v7 = vadd.f32 %v1254_v5, %v662_v41  ;;  %v2449_v8 = vadd.f32 %v1356_v6, %v670_v42  ;;  %v1256_v9 = vpop.f32.mrb[13].mxu1  ;;  %v1358_v10 = vpop.f32.mrb[13].mxu0 }
 0x4f3   :  { %1899 = vpow2.f32 %v1599_v2  ;;  %v2451_v11 = vadd.f32 %v1256_v9, %v666_v43  ;;  %v2453_v12 = vadd.f32 %v1358_v10, %v674_v44  ;;  %v1258_v13 = vpop.f32.mrb[14].mxu1  ;;  %v1360_v14 = vpop.f32.mrb[14].mxu0 }
 0x4f4   :  { %1901 = vpow2.f32 %v1598_v3  ;;  %v1601_v15 = vmul.f32 -1.442695, %v2447_v7  ;;  %v1603_v16 = vmul.f32 -1.442695, %v2449_v8  ;;  %v1259_v17 = vpop.f32.mrb[15].mxu1  ;;  %v1361_v18 = vpop.f32.mrb[15].mxu0 }
 0x4f5   :  { %1903 = vpow2.f32 %v1600_v4  ;;  %v1602_v19 = vmul.f32 -1.442695, %v2451_v11  ;;  %v1604_v20 = vmul.f32 -1.442695, %v2453_v12 }
 0x4f6   :  { %1905 = vpow2.f32 %v1601_v15 }
 0x4f7   :  { %1907 = vpow2.f32 %v1603_v16 }
 0x4f8   :  { %v1890_v21 = vpop.eup %1889  ;;  %1909 = vpow2.f32 %v1602_v19 }
 0x4f9   :  { %v1892_v22 = vpop.eup %1891  ;;  %v1399_v23 = vadd.f32 1.0, %v1890_v21  ;;  %1911 = vpow2.f32 %v1604_v20 }
 0x4fa   :  { %v1894_v25 = vpop.eup %1893  ;;  %v1401_v26 = vadd.f32 1.0, %v1892_v22 }
 0x4fb   :  { %v1896_v27 = vpop.eup %1895  ;;  %1913 = vrcp.f32 %v1399_v23  ;;  %v1400_v28 = vadd.f32 1.0, %v1894_v25 }
 0x4fc   :  { %v1898_v29 = vpop.eup %1897  ;;  %1915 = vrcp.f32 %v1401_v26  ;;  %v1402_v31 = vadd.f32 1.0, %v1896_v27 }
 0x4fd   :  { %v1900_v24 = vpop.eup %1899  ;;  %1917 = vrcp.f32 %v1400_v28  ;;  %v1403_v30 = vadd.f32 1.0, %v1898_v29 }
 0x4fe   :  { %v1902_v32 = vpop.eup %1901  ;;  %1919 = vrcp.f32 %v1402_v31  ;;  %v1405_v33 = vadd.f32 1.0, %v1900_v24 }
 0x4ff   :  { %v1904_v34 = vpop.eup %1903  ;;  %1921 = vrcp.f32 %v1403_v30  ;;  %v1404_v35 = vadd.f32 1.0, %v1902_v32 }
 0x500   :  { %v1906_v36 = vpop.eup %1905  ;;  %1923 = vrcp.f32 %v1405_v33  ;;  %v1406_v37 = vadd.f32 1.0, %v1904_v34 }
 0x501   :  { %v1908_v38 = vpop.eup %1907  ;;  %1925 = vrcp.f32 %v1404_v35  ;;  %v1407_v39 = vadd.f32 1.0, %v1906_v36 }
 0x502   :  { %v1910_v40 = vpop.eup %1909  ;;  %1927 = vrcp.f32 %v1406_v37  ;;  %v1409_v41 = vadd.f32 1.0, %v1908_v38 }
 0x503   :  { %v1912_v42 = vpop.eup %1911  ;;  %1929 = vrcp.f32 %v1407_v39  ;;  %v1408_v43 = vadd.f32 1.0, %v1910_v40 }
 0x504   :  { %1931 = vrcp.f32 %v1409_v41  ;;  %v1410_v44 = vadd.f32 1.0, %v1912_v42 }
 0x505   :  { %v1914_v45 = vpop.eup %1913  ;;  %1933 = vrcp.f32 %v1408_v43 }
 0x506   :  { %v1916_v59 = vpop.eup %1915  ;;  %v1435_v48 = vmul.f32 %v1914_v45, %v2423_v46  ;;  %1935 = vrcp.f32 %v1410_v44 }
 0x507   :  { %v1918_v49 = vpop.eup %1917  ;;  %v1437_v52 = vmul.f32 %v1916_v59, %v2425_v47 }
 0x508   :  { %v1920_v53 = vpop.eup %1919  ;;  %1447 = vst [vmem:[%s2517_s10] sm:$0xff] %v1435_v48  ;;  %v1436_v54 = vmul.f32 %v1918_v49, %v2427_v50 }
 0x509   :  { %v1922_v55 = vpop.eup %1921  ;;  %1449 = vst [vmem:[%s2517_s10 + $0x10] sm:$0xff] %v1437_v52  ;;  %v1438_v58 = vmul.f32 %v1920_v53, %v2429_v51 }
 0x50a   :  { %v1924_v60 = vpop.eup %1923  ;;  %1448 = vst [vmem:[%s2517_s10 + $0x8] sm:$0xff] %v1436_v54  ;;  %v1439_v46 = vmul.f32 %v1922_v55, %v2433_v56 }
 0x50b   :  { %v1926_v47 = vpop.eup %1925  ;;  %1450 = vst [vmem:[%s2517_s10 + $0x18] sm:$0xff] %v1438_v58  ;;  %v1441_v50 = vmul.f32 %v1924_v60, %v2435_v57 }
 0x50c   :  { %v1928_v61 = vpop.eup %1927  ;;  %1451 = vst [vmem:[%s2517_s10 + $0x20] sm:$0xff] %v1439_v46  ;;  %v1440_v51 = vmul.f32 %v1926_v47, %v2439_v63 }
 0x50d   :  { %v1930_v62 = vpop.eup %1929  ;;  %1453 = vst [vmem:[%s2517_s10 + $0x30] sm:$0xff] %v1441_v50  ;;  %v1442_v56 = vmul.f32 %v1928_v61, %v2441_v0 }
 0x50e   :  { %v1932_v1 = vpop.eup %1931  ;;  %1452 = vst [vmem:[%s2517_s10 + $0x28] sm:$0xff] %v1440_v51  ;;  %v1443_v57 = vmul.f32 %v1930_v62, %v2447_v7 }
 0x50f   :  { %v1934_v2 = vpop.eup %1933  ;;  %1454 = vst [vmem:[%s2517_s10 + $0x38] sm:$0xff] %v1442_v56  ;;  %v1445_v63 = vmul.f32 %v1932_v1, %v2449_v8 }
 0x510   :  { %v1936_v3 = vpop.eup %1935  ;;  %1455 = vst [vmem:[%s2517_s10 + $0x40] sm:$0x3] %v1443_v57  ;;  %v1444_v0 = vmul.f32 %v1934_v2, %v2451_v11 }
 0x511   :  { %1457 = vst [vmem:[%s2517_s10 + $0x50] sm:$0x3] %v1445_v63  ;;  %v1446_v4 = vmul.f32 %v1936_v3, %v2453_v12 }
 0x512   :  { %1456 = vst [vmem:[%s2517_s10 + $0x48] sm:$0x3] %v1444_v0 }
 0x513   :  { %1458 = vst [vmem:[%s2517_s10 + $0x58] sm:$0x3] %v1446_v4 }

</bundles_post_ra>
